<compile_context>
chip_gen: v7x
topology: tpu7x:2x2x1
jax: 0.10.0
libtpu: 0.0.40
codegen_flags: <defaults>
</compile_context>

<pallas_src>
import functools
import math

import jax
import jax.numpy as jnp
from jax.experimental import pallas as pl
from jax.experimental.pallas import tpu as pltpu


def _input_layer_kernel(x_ref, out_ref, *, eps):
    x = x_ref[...]
    # out_ref block is (2, tr, 128); write lower into slice 0, upper into 1.
    out_ref[0] = jnp.clip(x - eps, 0.0, 1.0)
    out_ref[1] = jnp.clip(x + eps, 0.0, 1.0)


def deep_poly_input_forward(x, eps, *, max_block_rows=2048):
    """Pallas equivalent of DeepPolyInputLayer.forward.

    x: any-shaped float array; eps: python float.
    Returns bounds of shape (2, *x.shape): [lower, upper].
    """
    orig_shape = x.shape
    dtype = x.dtype
    lanes = 128
    n = math.prod(orig_shape)
    rows = (n + lanes - 1) // lanes

    # Block rows: multiple of 8 (sublane alignment), capped for VMEM budget.
    tr = min(max_block_rows, ((rows + 7) // 8) * 8)
    # Pad rows so the grid tiles exactly (no silently dropped tail).
    rows_padded = ((rows + tr - 1) // tr) * tr
    n_padded = rows_padded * lanes
    assert rows_padded % tr == 0

    x_flat = jnp.ravel(x)
    if n_padded != n:
        x_flat = jnp.pad(x_flat, (0, n_padded - n))
    x2d = x_flat.reshape(rows_padded, lanes)

    kernel = functools.partial(_input_layer_kernel, eps=float(eps))

    out = pl.pallas_call(
        kernel,
        grid=(rows_padded // tr,),
        in_specs=[pl.BlockSpec((tr, lanes), lambda i: (i, 0))],
        out_specs=pl.BlockSpec((2, tr, lanes), lambda i: (0, i, 0)),
        out_shape=jax.ShapeDtypeStruct((2, rows_padded, lanes), dtype),
        compiler_params=pltpu.CompilerParams(
            dimension_semantics=("parallel",)),
    )(x2d)

    # Contiguous reshape + slice off padding (metadata-only reshape, tiny slice).
    bounds = out.reshape(2, n_padded)[:, :n].reshape((2,) + orig_shape)
    return bounds


def _reference(x, eps):
    lower = jnp.clip(x - eps, 0.0, 1.0)
    upper = jnp.clip(x + eps, 0.0, 1.0)
    return jnp.stack([lower, upper], axis=0)


if __name__ == "__main__":
    eps = 0.1
    key = jax.random.PRNGKey(0)
    k1, k2 = jax.random.split(key)

    # Small image-like input: batch=2, channels=4, 16x16 spatial -> 2048 elems
    # (exactly 16 lane-rows, no padding path).
    x1 = jax.random.uniform(k1, (2, 4, 16, 16), dtype=jnp.float32)
    out1 = jax.block_until_ready(deep_poly_input_forward(x1, eps))
    assert out1.shape == (2,) + x1.shape
    ref1 = _reference(x1, eps)
    assert bool(jnp.allclose(out1, ref1, atol=1e-6)), "mismatch on case 1"
    assert bool(jnp.all(out1[0] <= out1[1] + 1e-6))

    # MNIST-like input: 4x1x28x28 -> 3136 elems, exercises the padded-tail path.
    x2 = jax.random.uniform(k2, (4, 1, 28, 28), dtype=jnp.float32)
    out2 = jax.block_until_ready(deep_poly_input_forward(x2, eps))
    assert out2.shape == (2,) + x2.shape
    ref2 = _reference(x2, eps)
    assert bool(jnp.allclose(out2, ref2, atol=1e-6)), "mismatch on case 2"
    assert bool(jnp.all(out2[0] <= out2[1] + 1e-6))

    print("KERNEL_OK")
</pallas_src>

<mosaic_0001>
module attributes {stable_mosaic.version = 11 : i64} {
  func.func @_input_layer_kernel(%arg0: i32, %arg1: memref<16x128xf32, #tpu.memory_space<vmem>>, %arg2: memref<2x16x128xf32, #tpu.memory_space<vmem>>) attributes {dimension_semantics = [#tpu.dimension_semantics<parallel>], iteration_bounds = array<i64: 1>, scalar_prefetch = 0 : i64, scratch_operands = 0 : i64, tpu.core_type = #tpu.core_type<tc>, window_params = [{transform_indices = @transform_0, window_bounds = array<i64: 16, 128>}, {transform_indices = @transform_1, window_bounds = array<i64: 2, 16, 128>}]} {
    %c0 = arith.constant 0 : index
    %c0_0 = arith.constant 0 : index
    %0 = vector.load %arg1[%c0, %c0_0] : memref<16x128xf32, #tpu.memory_space<vmem>>, vector<16x128xf32>
    %cst = arith.constant 1.000000e-01 : f32
    %1 = vector.broadcast %cst : f32 to vector<16x128xf32>
    %2 = arith.subf %0, %1 : vector<16x128xf32>
    %cst_1 = arith.constant 0.000000e+00 : f32
    %cst_2 = arith.constant 1.000000e+00 : f32
    %3 = vector.broadcast %cst_1 : f32 to vector<16x128xf32>
    %4 = arith.maximumf %3, %2 : vector<16x128xf32>
    %5 = vector.broadcast %cst_2 : f32 to vector<16x128xf32>
    %6 = arith.minimumf %5, %4 : vector<16x128xf32>
    %c0_3 = arith.constant 0 : index
    %c0_4 = arith.constant 0 : index
    %c0_5 = arith.constant 0 : index
    %7 = vector.load %arg2[%c0_3, %c0_4, %c0_5] : memref<2x16x128xf32, #tpu.memory_space<vmem>>, vector<1x16x128xf32>
    %8 = vector.shape_cast %7 : vector<1x16x128xf32> to vector<16x128xf32>
    %9 = vector.shape_cast %6 : vector<16x128xf32> to vector<1x16x128xf32>
    tpu.vector_store %arg2[%c0_3, %c0_4, %c0_5], %9 {strides = array<i32>} : memref<2x16x128xf32, #tpu.memory_space<vmem>>, vector<1x16x128xf32>,
    %cst_6 = arith.constant 1.000000e-01 : f32
    %10 = vector.broadcast %cst_6 : f32 to vector<16x128xf32>
    %11 = arith.addf %0, %10 : vector<16x128xf32>
    %cst_7 = arith.constant 0.000000e+00 : f32
    %cst_8 = arith.constant 1.000000e+00 : f32
    %12 = vector.broadcast %cst_7 : f32 to vector<16x128xf32>
    %13 = arith.maximumf %12, %11 : vector<16x128xf32>
    %14 = vector.broadcast %cst_8 : f32 to vector<16x128xf32>
    %15 = arith.minimumf %14, %13 : vector<16x128xf32>
    %c1 = arith.constant 1 : index
    %c0_9 = arith.constant 0 : index
    %c0_10 = arith.constant 0 : index
    %16 = vector.load %arg2[%c1, %c0_9, %c0_10] : memref<2x16x128xf32, #tpu.memory_space<vmem>>, vector<1x16x128xf32>
    %17 = vector.shape_cast %16 : vector<1x16x128xf32> to vector<16x128xf32>
    %18 = vector.shape_cast %15 : vector<16x128xf32> to vector<1x16x128xf32>
    tpu.vector_store %arg2[%c1, %c0_9, %c0_10], %18 {strides = array<i32>} : memref<2x16x128xf32, #tpu.memory_space<vmem>>, vector<1x16x128xf32>,
    return
  }
  func.func @transform_0(%arg0: i32) -> (i32, i32) {
    %c0_i32 = arith.constant 0 : i32
    %c0_i32_0 = arith.constant 0 : i32
    return %arg0, %c0_i32 : i32, i32
  }
  func.func @transform_1(%arg0: i32) -> (i32, i32, i32) {
    %c0_i32 = arith.constant 0 : i32
    %c0_i32_0 = arith.constant 0 : i32
    %c0_i32_1 = arith.constant 0 : i32
    return %c0_i32, %arg0, %c0_i32_0 : i32, i32, i32
  }
}

</mosaic_0001>

<bundles_post_ra>
// kernel: tpu_custom_call.1
= control target key start
LH: loop header
LB: loop body
LE: loop exit
PB: predicated region body
PF: predicated region fallthrough
CT: control target
= control target key end

     0   :  { %6 = vsyncpa [#allocation3], 0  ;;  %s157_s0 = inlined_call_operand.hbm [shape: f32[16,128], index: 0, kind: input, shape index: {}]   ;;  %s158_s1 = inlined_call_operand.hbm [shape: f32[2,16,128], index: 1, kind: output, shape index: {}]  }
   0x1   :  { %7 = vsyncpa [#allocation4], 0  ;;  %s113_s6 = smov [#allocation2]   ;;  %s65_s10 = scalar_lea.hbm %s157_s0, 256 }
   0x2   :  { %s13_s7 = sshll.u32 %s113_s6, 4  ;;  %p66_p0 = scmp.ne.s32.totalorder %s157_s0, %s65_s10  ;;  %s14_s7 = int_to_ptr.vmem [resolvable:$true] %s13_s7 }
   0x3   :  { %p69_p1 = scmp.lt.u32.totalorder %s65_s10, %s157_s0 }
   0x5   :  { %p71_p2 = pnand %p69_p1, %p66_p0 }
   0x7   :  { %74 = shalt.err (!%p71_p2)
}
   0x8   :  { %s75_s15 = scalar_lea.vmem %s14_s7, 256  ;;  %p80_p4 = scmp.lt.s32.totalorder %s14_s7, %s14_s7 }
   0x9   :  { %p76_p3 = scmp.ne.s32.totalorder %s14_s7, %s75_s15  ;;  %p81_p5 = scmp.lt.s32.totalorder %s75_s15, %s75_s15 }
   0xb   :  { %p82_p6 = por %p81_p5, %p80_p4 }
   0xd   :  { %p83_p7 = pnand %p82_p6, %p76_p3 }
   0xf   :  { %86 = shalt.err (!%p83_p7)
}
  0x10   :  { %s114_s16 = smov 128   ;;  %s115_s17 = smov 8  }
  0x11   :  { %19 = dma.hbm_to_vmem [thread:$0]  %s157_s0, 256, %s14_s7, [#allocation3], %s114_s16, %s114_s16, %s115_s17  }
  0x12   :  { %109 = dma.done.wait [#allocation3], 256  }
  0x13   :  { %110 = vsyncadd [#allocation3], 4294967040  ;;  %v23_v0 = vld [vmem:[#allocation2] sm:$0xff]  ;;  %v24_v1 = vld [vmem:[#allocation2 + $0x8] sm:$0xff]  ;;  %s116_s20 = smov [#allocation5]  }
  0x14   :  { %v59_v2 = vadd.f32 -0.1, %v23_v0  ;;  %v60_v3 = vadd.f32 -0.1, %v24_v1  ;;  %v33_v4 = vadd.f32 0.1, %v23_v0 }
  0x15   :  { %v34_v5 = vadd.f32 0.1, %v24_v1  ;;  %s47_s21 = sshll.u32 %s116_s20, 4  ;;  %s48_s21 = int_to_ptr.vmem [resolvable:$true] %s47_s21 }
  0x16   :  { %v27_v6 = vmax.f32 %v59_v2, 0.0  ;;  %v28_v7 = vmax.f32 %v60_v3, 0.0  ;;  %v35_v8 = vmax.f32 %v33_v4, 0.0  ;;  %s87_s0 = scalar_lea.vmem %s48_s21, 512  ;;  %p92_p9 = scmp.lt.s32.totalorder %s48_s21, %s48_s21 }
  0x17   :  { %v36_v9 = vmax.f32 %v34_v5, 0.0  ;;  %p88_p8 = scmp.ne.s32.totalorder %s48_s21, %s87_s0  ;;  %p93_p10 = scmp.lt.s32.totalorder %s87_s0, %s87_s0 }
  0x18   :  { %v29_v10 = vmin.f32 %v27_v6, 1.0  ;;  %v30_v11 = vmin.f32 %v28_v7, 1.0  ;;  %v37_v12 = vmin.f32 %v35_v8, 1.0 }
  0x19   :  { %v38_v13 = vmin.f32 %v36_v9, 1.0  ;;  %p94_p11 = por %p93_p10, %p92_p9 }
  0x1a   :  { %31 = vst [vmem:[#allocation5] sm:$0xff] %v29_v10  ;;  %32 = vst [vmem:[#allocation5 + $0x8] sm:$0xff] %v30_v11 }
  0x1b   :  { %40 = vst [vmem:[#allocation5 + $0x10] sm:$0xff] %v37_v12  ;;  %41 = vst [vmem:[#allocation5 + $0x18] sm:$0xff] %v38_v13  ;;  %p95_p12 = pnand %p94_p11, %p88_p8 }
  0x1d   :  { %98 = shalt.err (!%p95_p12)
}
  0x1e   :  { %s99_s24 = scalar_lea.hbm %s158_s1, 512 }
  0x1f   :  { %p100_p13 = scmp.ne.s32.totalorder %s158_s1, %s99_s24  ;;  %p103_p0 = scmp.lt.u32.totalorder %s99_s24, %s158_s1 }
  0x21   :  { %p105_p1 = pnand %p103_p0, %p100_p13 }
  0x23   :  { %108 = shalt.err (!%p105_p1)
}
  0x24   :  { %53 = dma.vmem_to_hbm [thread:$0]  %s48_s21, 512, %s158_s1, [#allocation4], %s114_s16, %s114_s16, %s115_s17  }
  0x25   :  { %111 = dma.done.wait [#allocation4], 512  }
  0x26   :  { %112 = vsyncadd [#allocation4], 4294966784 }
  0x27   :  { %57 = vsyncpa [#allocation3], 1 }
  0x28   :  { %58 = vsyncpa [#allocation4], 1 }

</bundles_post_ra>
